<compile_context>
chip_gen: v5e
topology: v5e:2x2
jax: 0.10.0
libtpu: 0.0.40
codegen_flags: <defaults>
</compile_context>

<pallas_src>
import functools

import jax
import jax.numpy as jnp
from jax import lax
from jax.experimental import pallas as pl
from jax.experimental.pallas import tpu as pltpu


def _gelu(x):
    # tanh-approximate GELU (EUP-friendly on TPU).
    c = jnp.float32(0.7978845608028654)  # sqrt(2/pi)
    return 0.5 * x * (1.0 + jnp.tanh(c * (x + 0.044715 * x * x * x)))


def _layernorm(y, gamma, beta, eps):
    mean = jnp.mean(y, axis=-1, keepdims=True)
    var = jnp.mean((y - mean) ** 2, axis=-1, keepdims=True)
    return (y - mean) / jnp.sqrt(var + eps) * gamma + beta


# Contract the last dim of both operands (q @ k^T without materializing k.T).
_TRANS_B = (((1,), (1,)), ((), ()))


def _head_group(num_heads, head_dim):
    """Largest group size dividing num_heads whose combined width is lane-dense
    (>=128 lanes) — e.g. ViT-Base head_dim=64 -> pairs of heads."""
    if head_dim >= 128:
        return 1
    g = min(num_heads, max(1, 128 // head_dim))
    while num_heads % g:
        g -= 1
    return max(g, 1)


def encoder_layer_kernel(
    x_ref,
    wq_ref, bq_ref, wkv_ref, bkv_ref,
    wo_ref, bo_ref, g1_ref, beta1_ref,
    w1_ref, b1_ref, w2_ref, b2_ref, g2_ref, beta2_ref,
    o_ref,
    kv_ref, ctx_ref, *, num_heads, seq_tile, eps,
):
    bf16 = jnp.bfloat16
    f32 = jnp.float32

    S, E = x_ref.shape[1], x_ref.shape[2]
    TS = seq_tile
    hd = E // num_heads
    group = _head_group(num_heads, hd)
    scale = jnp.float32(1.0 / (hd ** 0.5))

    # ---------- fused K|V projection: computed once per batch element ----------
    # The full-sequence slab's block index is constant along the seq axis, so the
    # pipeline DMAs it once per batch element; the projection is likewise done
    # only at seq step 0 and cached as bf16 in VMEM scratch.
    @pl.when(pl.program_id(1) == 0)
    def _():
        xf = x_ref[0].astype(bf16)                                      # (S, E)
        kv = jnp.dot(xf, wkv_ref[...], preferred_element_type=f32) + bkv_ref[...]
        kv_ref[...] = kv.astype(bf16)                                   # (S, 2E) = [K | V]

    # ----- query / residual tile sliced out of the resident full-seq slab ------
    start = pl.multiple_of(pl.program_id(1) * TS, TS)
    x_q = x_ref[0, pl.ds(start, TS), :]                                 # (TS, E) f32
    q = jnp.dot(x_q.astype(bf16), wq_ref[...], preferred_element_type=f32)
    q = (q + bq_ref[...]) * scale                                       # fold 1/sqrt(hd) into Q
    qb = q.astype(bf16)

    # -------------------------- multi-headed attention --------------------------
    # Heads are processed in lane-aligned groups; each group's contexts are
    # concatenated and stored as ONE lane-dense block into the bf16 ctx scratch,
    # so the output projection below is a single full-K (TS,E)@(E,E) matmul.
    for h0 in range(0, num_heads, group):
        parts = []
        for hh in range(group):
            h = h0 + hh
            ks = slice(h * hd, (h + 1) * hd)          # K columns in kv cache
            vs = slice(E + h * hd, E + (h + 1) * hd)  # V columns in kv cache
            s_h = lax.dot_general(qb[:, ks], kv_ref[:, ks], _TRANS_B,
                                  preferred_element_type=f32)           # (TS, S)
            s_h = s_h - jnp.max(s_h, axis=-1, keepdims=True)
            p = jnp.exp(s_h)
            denom = jnp.sum(p, axis=-1, keepdims=True)
            p = p * pl.reciprocal(denom, approx=True)                   # EUP divide
            parts.append(jnp.dot(p.astype(bf16), kv_ref[:, vs],
                                 preferred_element_type=f32))           # (TS, hd)
        blk = parts[0] if group == 1 else jnp.concatenate(parts, axis=-1)
        ctx_ref[:, h0 * hd:(h0 + group) * hd] = blk.astype(bf16)

    # Single (TS, E) @ (E, E) projection of the concatenated heads (bf16 inputs).
    attn = jnp.dot(ctx_ref[...], wo_ref[...], preferred_element_type=f32) + bo_ref[...]

    # -------------------------- residual + LayerNorm 1 --------------------------
    y = _layernorm(attn + x_q, g1_ref[...], beta1_ref[...], eps)

    # ---------------- MLP: Linear -> GELU -> Linear (bf16 matmuls) --------------
    h1 = jnp.dot(y.astype(bf16), w1_ref[...], preferred_element_type=f32) + b1_ref[...]
    h1 = _gelu(h1)
    h2 = jnp.dot(h1.astype(bf16), w2_ref[...], preferred_element_type=f32) + b2_ref[...]

    # -------------------------- residual + LayerNorm 2 --------------------------
    o_ref[0] = _layernorm(h2 + y, g2_ref[...], beta2_ref[...], eps)


def prepare_encoder_params(params):
    """One-time parameter prep: split Q from fused QKV, fuse K|V, pre-cast matmul
    weights to bf16 (do this at setup, NOT per forward)."""
    bf16 = jnp.bfloat16
    E = params["wo"].shape[0]
    wqkv, bqkv = params["wqkv"], params["bqkv"]
    return {
        "wq":  wqkv[:, :E].astype(bf16), "bq":  bqkv[:, :E],
        "wkv": wqkv[:, E:].astype(bf16), "bkv": bqkv[:, E:],   # fused [Wk | Wv]
        "wo":  params["wo"].astype(bf16), "bo": params["bo"],
        "g1":  params["g1"], "beta1": params["beta1"],
        "w1":  params["w1"].astype(bf16), "b1": params["b1"],
        "w2":  params["w2"].astype(bf16), "b2": params["b2"],
        "g2":  params["g2"], "beta2": params["beta2"],
    }


def _seq_tile(S):
    # Whole sequence if small; otherwise target the 256-wide MXU sweet spot.
    if S <= 256:
        return S
    for ts in (256, 512, 128, 64, 32, 16, 8):
        if S % ts == 0:
            return ts
    return S


_WEIGHT_NAMES = ("wq", "bq", "wkv", "bkv", "wo", "bo", "g1", "beta1",
                 "w1", "b1", "w2", "b2", "g2", "beta2")


def encoder_layer(x, prepared, *, num_heads, eps=1e-5, seq_tile=None):
    B, S, E = x.shape
    TS = seq_tile if seq_tile is not None else _seq_tile(S)
    assert S % TS == 0, "sequence length must be divisible by the sequence tile"

    weights = [prepared[n] for n in _WEIGHT_NAMES]

    # One f32 activation input: the full-sequence slab (constant block index per
    # batch element -> fetched once per batch element); the (TS,E) query/residual
    # tile is sliced out in-kernel, so we do not DMA the same rows twice.
    # TODO(synk): optionally feed a pre-cast bf16 slab (bf16 residual) on v5e if
    # the activation DMA ever dominates.
    in_specs = [pl.BlockSpec((1, S, E), lambda b, s: (b, 0, 0))]
    for w in weights:
        # Grid-invariant weights: single-buffer (constant index_map) to halve the
        # weight VMEM residency (~13.5 MiB instead of ~27 MiB at ViT-Base).
        in_specs.append(
            pl.BlockSpec(w.shape, lambda b, s: (0, 0), pipeline_mode=pl.Buffered(1)))

    kernel = functools.partial(encoder_layer_kernel, num_heads=num_heads,
                               seq_tile=TS, eps=eps)
    return pl.pallas_call(
        kernel,
        out_shape=jax.ShapeDtypeStruct((B, S, E), jnp.float32),
        grid=(B, S // TS),
        in_specs=in_specs,
        out_specs=pl.BlockSpec((1, TS, E), lambda b, s: (b, s, 0)),
        scratch_shapes=[
            pltpu.VMEM((S, 2 * E), jnp.bfloat16),   # cached [K | V] per batch elem
            pltpu.VMEM((TS, E), jnp.bfloat16),      # concatenated head contexts
        ],
        compiler_params=pltpu.CompilerParams(
            # batch "parallel" (megacore sharding on v7x); seq "arbitrary" so the
            # per-batch K/V cache sees sequential seq steps on one core.
            dimension_semantics=("parallel", "arbitrary"),
            # 48 MiB leaves headroom below v7x's 64 MiB physical VMEM.
            vmem_limit_bytes=48 * 1024 * 1024,
        ),
    )(x, *weights)


# ---------------------- pure-JAX (f32) reference ----------------------
def encoder_layer_ref(x, p, *, num_heads, eps=1e-5):
    B, S, E = x.shape
    hd = E // num_heads

    def ln(y, g, b):
        m = jnp.mean(y, -1, keepdims=True)
        v = jnp.mean((y - m) ** 2, -1, keepdims=True)
        return (y - m) / jnp.sqrt(v + eps) * g + b

    qkv = x @ p["wqkv"] + p["bqkv"]
    q, k, v = jnp.split(qkv, 3, axis=-1)
    sh = lambda t: t.reshape(B, S, num_heads, hd).transpose(0, 2, 1, 3)
    q, k, v = sh(q), sh(k), sh(v)
    scores = jnp.einsum("bhqd,bhkd->bhqk", q, k) / jnp.sqrt(jnp.float32(hd))
    scores = scores - scores.max(-1, keepdims=True)
    pr = jnp.exp(scores)
    pr = pr / pr.sum(-1, keepdims=True)
    attn = jnp.einsum("bhqk,bhkd->bhqd", pr, v).transpose(0, 2, 1, 3).reshape(B, S, E)
    attn = attn @ p["wo"] + p["bo"]
    y = ln(attn + x, p["g1"], p["beta1"])
    h = _gelu(y @ p["w1"] + p["b1"])
    h = h @ p["w2"] + p["b2"]
    return ln(h + y, p["g2"], p["beta2"])


def init_params(key, embed, hidden):
    ks = jax.random.split(key, 10)
    s = 0.05
    f32 = jnp.float32
    return {
        "wqkv": jax.random.normal(ks[0], (embed, 3 * embed), f32) * s,
        "bqkv": jax.random.normal(ks[1], (1, 3 * embed), f32) * s,
        "wo":   jax.random.normal(ks[2], (embed, embed), f32) * s,
        "bo":   jax.random.normal(ks[3], (1, embed), f32) * s,
        "g1":   jnp.ones((1, embed), f32) + jax.random.normal(ks[4], (1, embed), f32) * s,
        "beta1": jax.random.normal(ks[5], (1, embed), f32) * s,
        "w1":   jax.random.normal(ks[6], (embed, hidden), f32) * s,
        "b1":   jax.random.normal(ks[7], (1, hidden), f32) * s,
        "w2":   jax.random.normal(ks[8], (hidden, embed), f32) * s,
        "b2":   jax.random.normal(ks[9], (1, embed), f32) * s,
        "g2":   jnp.ones((1, embed), f32),
        "beta2": jnp.zeros((1, embed), f32),
    }


if __name__ == "__main__":
    # Small shapes; seq_tile=8 forces a 2-tile sequence axis so the K/V caching
    # (compute at seq step 0, reuse at step 1) and the (batch, seq) grid are
    # actually exercised.
    B, S, E, H, MLP_H = 2, 16, 32, 4, 64

    key = jax.random.PRNGKey(0)
    kx, kp = jax.random.split(key)
    x = jax.random.normal(kx, (B, S, E), jnp.float32)
    params = init_params(kp, E, MLP_H)
    prepared = prepare_encoder_params(params)   # one-time bf16 cast / fuse / split

    out = encoder_layer(x, prepared, num_heads=H, seq_tile=8)
    out = jax.block_until_ready(out)

    ref = encoder_layer_ref(x, params, num_heads=H)
    err = jnp.max(jnp.abs(out - ref))
    assert out.shape == (B, S, E)
    # bf16 matmul inputs + approx reciprocal vs. the f32 reference -> loose tol.
    assert jnp.allclose(out, ref, atol=3e-2, rtol=3e-2), f"max abs err = {err}"

    print("KERNEL_OK")
</pallas_src>

<mosaic_0001>
module attributes {stable_mosaic.version = 11 : i64} {
  func.func @encoder_layer_kernel(%arg0: i32, %arg1: i32, %arg2: memref<1x16x32xf32, #tpu.memory_space<vmem>>, %arg3: memref<32x32xbf16, #tpu.memory_space<vmem>>, %arg4: memref<1x32xf32, #tpu.memory_space<vmem>>, %arg5: memref<32x64xbf16, #tpu.memory_space<vmem>>, %arg6: memref<1x64xf32, #tpu.memory_space<vmem>>, %arg7: memref<32x32xbf16, #tpu.memory_space<vmem>>, %arg8: memref<1x32xf32, #tpu.memory_space<vmem>>, %arg9: memref<1x32xf32, #tpu.memory_space<vmem>>, %arg10: memref<1x32xf32, #tpu.memory_space<vmem>>, %arg11: memref<32x64xbf16, #tpu.memory_space<vmem>>, %arg12: memref<1x64xf32, #tpu.memory_space<vmem>>, %arg13: memref<64x32xbf16, #tpu.memory_space<vmem>>, %arg14: memref<1x32xf32, #tpu.memory_space<vmem>>, %arg15: memref<1x32xf32, #tpu.memory_space<vmem>>, %arg16: memref<1x32xf32, #tpu.memory_space<vmem>>, %arg17: memref<1x8x32xf32, #tpu.memory_space<vmem>>, %arg18: memref<16x64xbf16, #tpu.memory_space<vmem>>, %arg19: memref<8x32xbf16, #tpu.memory_space<vmem>>) attributes {dimension_semantics = [#tpu.dimension_semantics<parallel>, #tpu.dimension_semantics<arbitrary>], iteration_bounds = array<i64: 2, 2>, scalar_prefetch = 0 : i64, scratch_operands = 2 : i64, tpu.core_type = #tpu.core_type<tc>, window_params = [{transform_indices = @transform_0, window_bounds = array<i64: 1, 16, 32>}, {pipeline_mode = #tpu.pipeline_mode<synchronous>, transform_indices = @transform_1, window_bounds = array<i64: 32, 32>}, {pipeline_mode = #tpu.pipeline_mode<synchronous>, transform_indices = @transform_2, window_bounds = array<i64: 1, 32>}, {pipeline_mode = #tpu.pipeline_mode<synchronous>, transform_indices = @transform_3, window_bounds = array<i64: 32, 64>}, {pipeline_mode = #tpu.pipeline_mode<synchronous>, transform_indices = @transform_4, window_bounds = array<i64: 1, 64>}, {pipeline_mode = #tpu.pipeline_mode<synchronous>, transform_indices = @transform_5, window_bounds = array<i64: 32, 32>}, {pipeline_mode = #tpu.pipeline_mode<synchronous>, transform_indices = @transform_6, window_bounds = array<i64: 1, 32>}, {pipeline_mode = #tpu.pipeline_mode<synchronous>, transform_indices = @transform_7, window_bounds = array<i64: 1, 32>}, {pipeline_mode = #tpu.pipeline_mode<synchronous>, transform_indices = @transform_8, window_bounds = array<i64: 1, 32>}, {pipeline_mode = #tpu.pipeline_mode<synchronous>, transform_indices = @transform_9, window_bounds = array<i64: 32, 64>}, {pipeline_mode = #tpu.pipeline_mode<synchronous>, transform_indices = @transform_10, window_bounds = array<i64: 1, 64>}, {pipeline_mode = #tpu.pipeline_mode<synchronous>, transform_indices = @transform_11, window_bounds = array<i64: 64, 32>}, {pipeline_mode = #tpu.pipeline_mode<synchronous>, transform_indices = @transform_12, window_bounds = array<i64: 1, 32>}, {pipeline_mode = #tpu.pipeline_mode<synchronous>, transform_indices = @transform_13, window_bounds = array<i64: 1, 32>}, {pipeline_mode = #tpu.pipeline_mode<synchronous>, transform_indices = @transform_14, window_bounds = array<i64: 1, 32>}, {transform_indices = @transform_15, window_bounds = array<i64: 1, 8, 32>}]} {
    %c0_i32 = arith.constant 0 : i32
    %0 = arith.cmpi eq, %arg1, %c0_i32 : i32
    %1 = arith.extui %0 : i1 to i32
    %c0_i32_0 = arith.constant 0 : i32
    %2 = arith.cmpi ne, %1, %c0_i32_0 : i32
    scf.if %2 {
      %c0_76 = arith.constant 0 : index
      %c0_77 = arith.constant 0 : index
      %c0_78 = arith.constant 0 : index
      %168 = vector.load %arg2[%c0_76, %c0_77, %c0_78] : memref<1x16x32xf32, #tpu.memory_space<vmem>>, vector<1x16x32xf32>
      %169 = vector.shape_cast %168 : vector<1x16x32xf32> to vector<16x32xf32>
      %170 = arith.truncf %169 : vector<16x32xf32> to vector<16x32xbf16>
      %c0_79 = arith.constant 0 : index
      %c0_80 = arith.constant 0 : index
      %171 = vector.load %arg5[%c0_79, %c0_80] : memref<32x64xbf16, #tpu.memory_space<vmem>>, vector<32x64xbf16>
      %cst_81 = arith.constant dense<0.000000e+00> : vector<16x64xf32>
      %172 = tpu.matmul %170, %171, %cst_81 {dimension_numbers = #tpu.dot_dimension_numbers<[1], [0], [0], [1], [0, 0, 1, 1], [], []>} : vector<16x32xbf16>, vector<32x64xbf16>, vector<16x64xf32> -> vector<16x64xf32>
      %c0_82 = arith.constant 0 : index
      %c0_83 = arith.constant 0 : index
      %173 = vector.load %arg6[%c0_82, %c0_83] : memref<1x64xf32, #tpu.memory_space<vmem>>, vector<1x64xf32>
      %174 = vector.broadcast %173 : vector<1x64xf32> to vector<16x64xf32>
      %175 = arith.addf %172, %174 : vector<16x64xf32>
      %176 = arith.truncf %175 : vector<16x64xf32> to vector<16x64xbf16>
      %c0_84 = arith.constant 0 : index
      %c0_85 = arith.constant 0 : index
      %177 = vector.load %arg18[%c0_84, %c0_85] : memref<16x64xbf16, #tpu.memory_space<vmem>>, vector<16x64xbf16>
      tpu.vector_store %arg18[%c0_84, %c0_85], %176 {strides = array<i32>} : memref<16x64xbf16, #tpu.memory_space<vmem>>, vector<16x64xbf16>,
    } else {
    }
    %c8_i32 = arith.constant 8 : i32
    %3 = arith.muli %arg1, %c8_i32 : i32
    %4 = tpu.assume_multiple %3, 8 : i32
    %c0 = arith.constant 0 : index
    %5 = arith.index_cast %4 : i32 to index
    %c0_1 = arith.constant 0 : index
    %6 = vector.load %arg2[%c0, %5, %c0_1] : memref<1x16x32xf32, #tpu.memory_space<vmem>>, vector<1x8x32xf32>
    %7 = vector.shape_cast %6 : vector<1x8x32xf32> to vector<8x32xf32>
    %8 = arith.truncf %7 : vector<8x32xf32> to vector<8x32xbf16>
    %c0_2 = arith.constant 0 : index
    %c0_3 = arith.constant 0 : index
    %9 = vector.load %arg3[%c0_2, %c0_3] : memref<32x32xbf16, #tpu.memory_space<vmem>>, vector<32x32xbf16>
    %cst = arith.constant dense<0.000000e+00> : vector<8x32xf32>
    %10 = tpu.matmul %8, %9, %cst {dimension_numbers = #tpu.dot_dimension_numbers<[1], [0], [0], [1], [0, 0, 1, 1], [], []>} : vector<8x32xbf16>, vector<32x32xbf16>, vector<8x32xf32> -> vector<8x32xf32>
    %c0_4 = arith.constant 0 : index
    %c0_5 = arith.constant 0 : index
    %11 = vector.load %arg4[%c0_4, %c0_5] : memref<1x32xf32, #tpu.memory_space<vmem>>, vector<1x32xf32>
    %12 = vector.broadcast %11 : vector<1x32xf32> to vector<8x32xf32>
    %13 = arith.addf %10, %12 : vector<8x32xf32>
    %cst_6 = arith.constant 0.353553385 : f32
    %14 = vector.broadcast %cst_6 : f32 to vector<8x32xf32>
    %15 = arith.mulf %13, %14 : vector<8x32xf32>
    %16 = arith.truncf %15 : vector<8x32xf32> to vector<8x32xbf16>
    %17 = vector.extract_strided_slice %16 {offsets = [0, 0], sizes = [8, 8], strides = [1, 1]} : vector<8x32xbf16> to vector<8x8xbf16>
    %c0_7 = arith.constant 0 : index
    %c0_8 = arith.constant 0 : index
    %18 = vector.load %arg18[%c0_7, %c0_8] : memref<16x64xbf16, #tpu.memory_space<vmem>>, vector<16x8xbf16>
    %cst_9 = arith.constant dense<0.000000e+00> : vector<8x16xf32>
    %19 = tpu.matmul %17, %18, %cst_9 {dimension_numbers = #tpu.dot_dimension_numbers<[1], [1], [0], [0], [0, 0, 1, 0], [], []>} : vector<8x8xbf16>, vector<16x8xbf16>, vector<8x16xf32> -> vector<8x16xf32>
    %cst_10 = arith.constant dense<0xFF800000> : vector<8xf32>
    %20 = vector.multi_reduction <maximumf>, %19, %cst_10 [1] : vector<8x16xf32> to vector<8xf32>
    %21 = vector.shape_cast %20 : vector<8xf32> to vector<8x1xf32>
    %22 = vector.broadcast %21 : vector<8x1xf32> to vector<8x16xf32>
    %23 = arith.subf %19, %22 : vector<8x16xf32>
    %24 = math.exp %23 : vector<8x16xf32>
    %cst_11 = arith.constant dense<0.000000e+00> : vector<8xf32>
    %25 = vector.multi_reduction <add>, %24, %cst_11 [1] : vector<8x16xf32> to vector<8xf32>
    %26 = vector.shape_cast %25 : vector<8xf32> to vector<8x1xf32>
    %27 = tpu.reciprocal %26 {approx = true} : vector<8x1xf32> -> vector<8x1xf32>
    %28 = vector.broadcast %27 : vector<8x1xf32> to vector<8x16xf32>
    %29 = arith.mulf %24, %28 : vector<8x16xf32>
    %30 = arith.truncf %29 : vector<8x16xf32> to vector<8x16xbf16>
    %c0_12 = arith.constant 0 : index
    %c32 = arith.constant 32 : index
    %31 = vector.load %arg18[%c0_12, %c32] : memref<16x64xbf16, #tpu.memory_space<vmem>>, vector<16x8xbf16>
    %cst_13 = arith.constant dense<0.000000e+00> : vector<8x8xf32>
    %32 = tpu.matmul %30, %31, %cst_13 {dimension_numbers = #tpu.dot_dimension_numbers<[1], [0], [0], [1], [0, 0, 1, 1], [], []>} : vector<8x16xbf16>, vector<16x8xbf16>, vector<8x8xf32> -> vector<8x8xf32>
    %33 = vector.extract_strided_slice %16 {offsets = [0, 8], sizes = [8, 8], strides = [1, 1]} : vector<8x32xbf16> to vector<8x8xbf16>
    %c0_14 = arith.constant 0 : index
    %c8 = arith.constant 8 : index
    %34 = vector.load %arg18[%c0_14, %c8] : memref<16x64xbf16, #tpu.memory_space<vmem>>, vector<16x8xbf16>
    %cst_15 = arith.constant dense<0.000000e+00> : vector<8x16xf32>
    %35 = tpu.matmul %33, %34, %cst_15 {dimension_numbers = #tpu.dot_dimension_numbers<[1], [1], [0], [0], [0, 0, 1, 0], [], []>} : vector<8x8xbf16>, vector<16x8xbf16>, vector<8x16xf32> -> vector<8x16xf32>
    %cst_16 = arith.constant dense<0xFF800000> : vector<8xf32>
    %36 = vector.multi_reduction <maximumf>, %35, %cst_16 [1] : vector<8x16xf32> to vector<8xf32>
    %37 = vector.shape_cast %36 : vector<8xf32> to vector<8x1xf32>
    %38 = vector.broadcast %37 : vector<8x1xf32> to vector<8x16xf32>
    %39 = arith.subf %35, %38 : vector<8x16xf32>
    %40 = math.exp %39 : vector<8x16xf32>
    %cst_17 = arith.constant dense<0.000000e+00> : vector<8xf32>
    %41 = vector.multi_reduction <add>, %40, %cst_17 [1] : vector<8x16xf32> to vector<8xf32>
    %42 = vector.shape_cast %41 : vector<8xf32> to vector<8x1xf32>
    %43 = tpu.reciprocal %42 {approx = true} : vector<8x1xf32> -> vector<8x1xf32>
    %44 = vector.broadcast %43 : vector<8x1xf32> to vector<8x16xf32>
    %45 = arith.mulf %40, %44 : vector<8x16xf32>
    %46 = arith.truncf %45 : vector<8x16xf32> to vector<8x16xbf16>
    %c0_18 = arith.constant 0 : index
    %c40 = arith.constant 40 : index
    %47 = vector.load %arg18[%c0_18, %c40] : memref<16x64xbf16, #tpu.memory_space<vmem>>, vector<16x8xbf16>
    %cst_19 = arith.constant dense<0.000000e+00> : vector<8x8xf32>
    %48 = tpu.matmul %46, %47, %cst_19 {dimension_numbers = #tpu.dot_dimension_numbers<[1], [0], [0], [1], [0, 0, 1, 1], [], []>} : vector<8x16xbf16>, vector<16x8xbf16>, vector<8x8xf32> -> vector<8x8xf32>
    %49 = vector.extract_strided_slice %16 {offsets = [0, 16], sizes = [8, 8], strides = [1, 1]} : vector<8x32xbf16> to vector<8x8xbf16>
    %c0_20 = arith.constant 0 : index
    %c16 = arith.constant 16 : index
    %50 = vector.load %arg18[%c0_20, %c16] : memref<16x64xbf16, #tpu.memory_space<vmem>>, vector<16x8xbf16>
    %cst_21 = arith.constant dense<0.000000e+00> : vector<8x16xf32>
    %51 = tpu.matmul %49, %50, %cst_21 {dimension_numbers = #tpu.dot_dimension_numbers<[1], [1], [0], [0], [0, 0, 1, 0], [], []>} : vector<8x8xbf16>, vector<16x8xbf16>, vector<8x16xf32> -> vector<8x16xf32>
    %cst_22 = arith.constant dense<0xFF800000> : vector<8xf32>
    %52 = vector.multi_reduction <maximumf>, %51, %cst_22 [1] : vector<8x16xf32> to vector<8xf32>
    %53 = vector.shape_cast %52 : vector<8xf32> to vector<8x1xf32>
    %54 = vector.broadcast %53 : vector<8x1xf32> to vector<8x16xf32>
    %55 = arith.subf %51, %54 : vector<8x16xf32>
    %56 = math.exp %55 : vector<8x16xf32>
    %cst_23 = arith.constant dense<0.000000e+00> : vector<8xf32>
    %57 = vector.multi_reduction <add>, %56, %cst_23 [1] : vector<8x16xf32> to vector<8xf32>
    %58 = vector.shape_cast %57 : vector<8xf32> to vector<8x1xf32>
    %59 = tpu.reciprocal %58 {approx = true} : vector<8x1xf32> -> vector<8x1xf32>
    %60 = vector.broadcast %59 : vector<8x1xf32> to vector<8x16xf32>
    %61 = arith.mulf %56, %60 : vector<8x16xf32>
    %62 = arith.truncf %61 : vector<8x16xf32> to vector<8x16xbf16>
    %c0_24 = arith.constant 0 : index
    %c48 = arith.constant 48 : index
    %63 = vector.load %arg18[%c0_24, %c48] : memref<16x64xbf16, #tpu.memory_space<vmem>>, vector<16x8xbf16>
    %cst_25 = arith.constant dense<0.000000e+00> : vector<8x8xf32>
    %64 = tpu.matmul %62, %63, %cst_25 {dimension_numbers = #tpu.dot_dimension_numbers<[1], [0], [0], [1], [0, 0, 1, 1], [], []>} : vector<8x16xbf16>, vector<16x8xbf16>, vector<8x8xf32> -> vector<8x8xf32>
    %65 = vector.extract_strided_slice %16 {offsets = [0, 24], sizes = [8, 8], strides = [1, 1]} : vector<8x32xbf16> to vector<8x8xbf16>
    %c0_26 = arith.constant 0 : index
    %c24 = arith.constant 24 : index
    %66 = vector.load %arg18[%c0_26, %c24] : memref<16x64xbf16, #tpu.memory_space<vmem>>, vector<16x8xbf16>
    %cst_27 = arith.constant dense<0.000000e+00> : vector<8x16xf32>
    %67 = tpu.matmul %65, %66, %cst_27 {dimension_numbers = #tpu.dot_dimension_numbers<[1], [1], [0], [0], [0, 0, 1, 0], [], []>} : vector<8x8xbf16>, vector<16x8xbf16>, vector<8x16xf32> -> vector<8x16xf32>
    %cst_28 = arith.constant dense<0xFF800000> : vector<8xf32>
    %68 = vector.multi_reduction <maximumf>, %67, %cst_28 [1] : vector<8x16xf32> to vector<8xf32>
    %69 = vector.shape_cast %68 : vector<8xf32> to vector<8x1xf32>
    %70 = vector.broadcast %69 : vector<8x1xf32> to vector<8x16xf32>
    %71 = arith.subf %67, %70 : vector<8x16xf32>
    %72 = math.exp %71 : vector<8x16xf32>
    %cst_29 = arith.constant dense<0.000000e+00> : vector<8xf32>
    %73 = vector.multi_reduction <add>, %72, %cst_29 [1] : vector<8x16xf32> to vector<8xf32>
    %74 = vector.shape_cast %73 : vector<8xf32> to vector<8x1xf32>
    %75 = tpu.reciprocal %74 {approx = true} : vector<8x1xf32> -> vector<8x1xf32>
    %76 = vector.broadcast %75 : vector<8x1xf32> to vector<8x16xf32>
    %77 = arith.mulf %72, %76 : vector<8x16xf32>
    %78 = arith.truncf %77 : vector<8x16xf32> to vector<8x16xbf16>
    %c0_30 = arith.constant 0 : index
    %c56 = arith.constant 56 : index
    %79 = vector.load %arg18[%c0_30, %c56] : memref<16x64xbf16, #tpu.memory_space<vmem>>, vector<16x8xbf16>
    %cst_31 = arith.constant dense<0.000000e+00> : vector<8x8xf32>
    %80 = tpu.matmul %78, %79, %cst_31 {dimension_numbers = #tpu.dot_dimension_numbers<[1], [0], [0], [1], [0, 0, 1, 1], [], []>} : vector<8x16xbf16>, vector<16x8xbf16>, vector<8x8xf32> -> vector<8x8xf32>
    %81 = tpu.concatenate %32, %48, %64, %80 in 1 : vector<8x8xf32>, vector<8x8xf32>, vector<8x8xf32>, vector<8x8xf32> -> vector<8x32xf32>
    %82 = arith.truncf %81 : vector<8x32xf32> to vector<8x32xbf16>
    %c0_32 = arith.constant 0 : index
    %c0_33 = arith.constant 0 : index
    %83 = vector.load %arg19[%c0_32, %c0_33] : memref<8x32xbf16, #tpu.memory_space<vmem>>, vector<8x32xbf16>
    tpu.vector_store %arg19[%c0_32, %c0_33], %82 {strides = array<i32>} : memref<8x32xbf16, #tpu.memory_space<vmem>>, vector<8x32xbf16>,
    %c0_34 = arith.constant 0 : index
    %c0_35 = arith.constant 0 : index
    %84 = vector.load %arg19[%c0_34, %c0_35] : memref<8x32xbf16, #tpu.memory_space<vmem>>, vector<8x32xbf16>
    %c0_36 = arith.constant 0 : index
    %c0_37 = arith.constant 0 : index
    %85 = vector.load %arg7[%c0_36, %c0_37] : memref<32x32xbf16, #tpu.memory_space<vmem>>, vector<32x32xbf16>
    %cst_38 = arith.constant dense<0.000000e+00> : vector<8x32xf32>
    %86 = tpu.matmul %84, %85, %cst_38 {dimension_numbers = #tpu.dot_dimension_numbers<[1], [0], [0], [1], [0, 0, 1, 1], [], []>} : vector<8x32xbf16>, vector<32x32xbf16>, vector<8x32xf32> -> vector<8x32xf32>
    %c0_39 = arith.constant 0 : index
    %c0_40 = arith.constant 0 : index
    %87 = vector.load %arg8[%c0_39, %c0_40] : memref<1x32xf32, #tpu.memory_space<vmem>>, vector<1x32xf32>
    %88 = vector.broadcast %87 : vector<1x32xf32> to vector<8x32xf32>
    %89 = arith.addf %86, %88 : vector<8x32xf32>
    %90 = arith.addf %89, %7 : vector<8x32xf32>
    %c0_41 = arith.constant 0 : index
    %c0_42 = arith.constant 0 : index
    %91 = vector.load %arg9[%c0_41, %c0_42] : memref<1x32xf32, #tpu.memory_space<vmem>>, vector<1x32xf32>
    %c0_43 = arith.constant 0 : index
    %c0_44 = arith.constant 0 : index
    %92 = vector.load %arg10[%c0_43, %c0_44] : memref<1x32xf32, #tpu.memory_space<vmem>>, vector<1x32xf32>
    %cst_45 = arith.constant dense<0.000000e+00> : vector<8xf32>
    %93 = vector.multi_reduction <add>, %90, %cst_45 [1] : vector<8x32xf32> to vector<8xf32>
    %94 = vector.shape_cast %93 : vector<8xf32> to vector<8x1xf32>
    %cst_46 = arith.constant 3.200000e+01 : f32
    %95 = vector.broadcast %cst_46 : f32 to vector<8x1xf32>
    %96 = arith.divf %94, %95 : vector<8x1xf32>
    %97 = vector.broadcast %96 : vector<8x1xf32> to vector<8x32xf32>
    %98 = arith.subf %90, %97 : vector<8x32xf32>
    %99 = arith.mulf %98, %98 : vector<8x32xf32>
    %cst_47 = arith.constant dense<0.000000e+00> : vector<8xf32>
    %100 = vector.multi_reduction <add>, %99, %cst_47 [1] : vector<8x32xf32> to vector<8xf32>
    %101 = vector.shape_cast %100 : vector<8xf32> to vector<8x1xf32>
    %cst_48 = arith.constant 3.200000e+01 : f32
    %102 = vector.broadcast %cst_48 : f32 to vector<8x1xf32>
    %103 = arith.divf %101, %102 : vector<8x1xf32>
    %104 = vector.broadcast %96 : vector<8x1xf32> to vector<8x32xf32>
    %105 = arith.subf %90, %104 : vector<8x32xf32>
    %cst_49 = arith.constant 9.99999974E-6 : f32
    %106 = vector.broadcast %cst_49 : f32 to vector<8x1xf32>
    %107 = arith.addf %103, %106 : vector<8x1xf32>
    %108 = math.sqrt %107 : vector<8x1xf32>
    %109 = vector.broadcast %108 : vector<8x1xf32> to vector<8x32xf32>
    %110 = arith.divf %105, %109 : vector<8x32xf32>
    %111 = vector.broadcast %91 : vector<1x32xf32> to vector<8x32xf32>
    %112 = arith.mulf %110, %111 : vector<8x32xf32>
    %113 = vector.broadcast %92 : vector<1x32xf32> to vector<8x32xf32>
    %114 = arith.addf %112, %113 : vector<8x32xf32>
    %115 = arith.truncf %114 : vector<8x32xf32> to vector<8x32xbf16>
    %c0_50 = arith.constant 0 : index
    %c0_51 = arith.constant 0 : index
    %116 = vector.load %arg11[%c0_50, %c0_51] : memref<32x64xbf16, #tpu.memory_space<vmem>>, vector<32x64xbf16>
    %cst_52 = arith.constant dense<0.000000e+00> : vector<8x64xf32>
    %117 = tpu.matmul %115, %116, %cst_52 {dimension_numbers = #tpu.dot_dimension_numbers<[1], [0], [0], [1], [0, 0, 1, 1], [], []>} : vector<8x32xbf16>, vector<32x64xbf16>, vector<8x64xf32> -> vector<8x64xf32>
    %c0_53 = arith.constant 0 : index
    %c0_54 = arith.constant 0 : index
    %118 = vector.load %arg12[%c0_53, %c0_54] : memref<1x64xf32, #tpu.memory_space<vmem>>, vector<1x64xf32>
    %119 = vector.broadcast %118 : vector<1x64xf32> to vector<8x64xf32>
    %120 = arith.addf %117, %119 : vector<8x64xf32>
    %cst_55 = arith.constant 5.000000e-01 : f32
    %121 = vector.broadcast %cst_55 : f32 to vector<8x64xf32>
    %122 = arith.mulf %121, %120 : vector<8x64xf32>
    %cst_56 = arith.constant 4.471500e-02 : f32
    %123 = vector.broadcast %cst_56 : f32 to vector<8x64xf32>
    %124 = arith.mulf %123, %120 : vector<8x64xf32>
    %125 = arith.mulf %124, %120 : vector<8x64xf32>
    %126 = arith.mulf %125, %120 : vector<8x64xf32>
    %127 = arith.addf %120, %126 : vector<8x64xf32>
    %cst_57 = arith.constant 0.797884583 : f32
    %128 = vector.broadcast %cst_57 : f32 to vector<8x64xf32>
    %129 = arith.mulf %128, %127 : vector<8x64xf32>
    %130 = math.tanh %129 : vector<8x64xf32>
    %cst_58 = arith.constant 1.000000e+00 : f32
    %131 = vector.broadcast %cst_58 : f32 to vector<8x64xf32>
    %132 = arith.addf %131, %130 : vector<8x64xf32>
    %133 = arith.mulf %122, %132 : vector<8x64xf32>
    %134 = arith.truncf %133 : vector<8x64xf32> to vector<8x64xbf16>
    %c0_59 = arith.constant 0 : index
    %c0_60 = arith.constant 0 : index
    %135 = vector.load %arg13[%c0_59, %c0_60] : memref<64x32xbf16, #tpu.memory_space<vmem>>, vector<64x32xbf16>
    %cst_61 = arith.constant dense<0.000000e+00> : vector<8x32xf32>
    %136 = tpu.matmul %134, %135, %cst_61 {dimension_numbers = #tpu.dot_dimension_numbers<[1], [0], [0], [1], [0, 0, 1, 1], [], []>} : vector<8x64xbf16>, vector<64x32xbf16>, vector<8x32xf32> -> vector<8x32xf32>
    %c0_62 = arith.constant 0 : index
    %c0_63 = arith.constant 0 : index
    %137 = vector.load %arg14[%c0_62, %c0_63] : memref<1x32xf32, #tpu.memory_space<vmem>>, vector<1x32xf32>
    %138 = vector.broadcast %137 : vector<1x32xf32> to vector<8x32xf32>
    %139 = arith.addf %136, %138 : vector<8x32xf32>
    %140 = arith.addf %139, %114 : vector<8x32xf32>
    %c0_64 = arith.constant 0 : index
    %c0_65 = arith.constant 0 : index
    %141 = vector.load %arg15[%c0_64, %c0_65] : memref<1x32xf32, #tpu.memory_space<vmem>>, vector<1x32xf32>
    %c0_66 = arith.constant 0 : index
    %c0_67 = arith.constant 0 : index
    %142 = vector.load %arg16[%c0_66, %c0_67] : memref<1x32xf32, #tpu.memory_space<vmem>>, vector<1x32xf32>
    %cst_68 = arith.constant dense<0.000000e+00> : vector<8xf32>
    %143 = vector.multi_reduction <add>, %140, %cst_68 [1] : vector<8x32xf32> to vector<8xf32>
    %144 = vector.shape_cast %143 : vector<8xf32> to vector<8x1xf32>
    %cst_69 = arith.constant 3.200000e+01 : f32
    %145 = vector.broadcast %cst_69 : f32 to vector<8x1xf32>
    %146 = arith.divf %144, %145 : vector<8x1xf32>
    %147 = vector.broadcast %146 : vector<8x1xf32> to vector<8x32xf32>
    %148 = arith.subf %140, %147 : vector<8x32xf32>
    %149 = arith.mulf %148, %148 : vector<8x32xf32>
    %cst_70 = arith.constant dense<0.000000e+00> : vector<8xf32>
    %150 = vector.multi_reduction <add>, %149, %cst_70 [1] : vector<8x32xf32> to vector<8xf32>
    %151 = vector.shape_cast %150 : vector<8xf32> to vector<8x1xf32>
    %cst_71 = arith.constant 3.200000e+01 : f32
    %152 = vector.broadcast %cst_71 : f32 to vector<8x1xf32>
    %153 = arith.divf %151, %152 : vector<8x1xf32>
    %154 = vector.broadcast %146 : vector<8x1xf32> to vector<8x32xf32>
    %155 = arith.subf %140, %154 : vector<8x32xf32>
    %cst_72 = arith.constant 9.99999974E-6 : f32
    %156 = vector.broadcast %cst_72 : f32 to vector<8x1xf32>
    %157 = arith.addf %153, %156 : vector<8x1xf32>
    %158 = math.sqrt %157 : vector<8x1xf32>
    %159 = vector.broadcast %158 : vector<8x1xf32> to vector<8x32xf32>
    %160 = arith.divf %155, %159 : vector<8x32xf32>
    %161 = vector.broadcast %141 : vector<1x32xf32> to vector<8x32xf32>
    %162 = arith.mulf %160, %161 : vector<8x32xf32>
    %163 = vector.broadcast %142 : vector<1x32xf32> to vector<8x32xf32>
    %164 = arith.addf %162, %163 : vector<8x32xf32>
    %c0_73 = arith.constant 0 : index
    %c0_74 = arith.constant 0 : index
    %c0_75 = arith.constant 0 : index
    %165 = vector.load %arg17[%c0_73, %c0_74, %c0_75] : memref<1x8x32xf32, #tpu.memory_space<vmem>>, vector<1x8x32xf32>
    %166 = vector.shape_cast %165 : vector<1x8x32xf32> to vector<8x32xf32>
    %167 = vector.shape_cast %164 : vector<8x32xf32> to vector<1x8x32xf32>
    tpu.vector_store %arg17[%c0_73, %c0_74, %c0_75], %167 {strides = array<i32>} : memref<1x8x32xf32, #tpu.memory_space<vmem>>, vector<1x8x32xf32>,
    return
  }
  func.func @transform_0(%arg0: i32, %arg1: i32) -> (i32, i32, i32) {
    %c0_i32 = arith.constant 0 : i32
    %c0_i32_0 = arith.constant 0 : i32
    %c0_i32_1 = arith.constant 0 : i32
    return %arg0, %c0_i32, %c0_i32_0 : i32, i32, i32
  }
  func.func @transform_1(%arg0: i32, %arg1: i32) -> (i32, i32) {
    %c0_i32 = arith.constant 0 : i32
    %c0_i32_0 = arith.constant 0 : i32
    %c0_i32_1 = arith.constant 0 : i32
    return %c0_i32, %c0_i32_0 : i32, i32
  }
  func.func @transform_2(%arg0: i32, %arg1: i32) -> (i32, i32) {
    %c0_i32 = arith.constant 0 : i32
    %c0_i32_0 = arith.constant 0 : i32
    %c0_i32_1 = arith.constant 0 : i32
    return %c0_i32, %c0_i32_0 : i32, i32
  }
  func.func @transform_3(%arg0: i32, %arg1: i32) -> (i32, i32) {
    %c0_i32 = arith.constant 0 : i32
    %c0_i32_0 = arith.constant 0 : i32
    %c0_i32_1 = arith.constant 0 : i32
    return %c0_i32, %c0_i32_0 : i32, i32
  }
  func.func @transform_4(%arg0: i32, %arg1: i32) -> (i32, i32) {
    %c0_i32 = arith.constant 0 : i32
    %c0_i32_0 = arith.constant 0 : i32
    %c0_i32_1 = arith.constant 0 : i32
    return %c0_i32, %c0_i32_0 : i32, i32
  }
  func.func @transform_5(%arg0: i32, %arg1: i32) -> (i32, i32) {
    %c0_i32 = arith.constant 0 : i32
    %c0_i32_0 = arith.constant 0 : i32
    %c0_i32_1 = arith.constant 0 : i32
    return %c0_i32, %c0_i32_0 : i32, i32
  }
  func.func @transform_6(%arg0: i32, %arg1: i32) -> (i32, i32) {
    %c0_i32 = arith.constant 0 : i32
    %c0_i32_0 = arith.constant 0 : i32
    %c0_i32_1 = arith.constant 0 : i32
    return %c0_i32, %c0_i32_0 : i32, i32
  }
  func.func @transform_7(%arg0: i32, %arg1: i32) -> (i32, i32) {
    %c0_i32 = arith.constant 0 : i32
    %c0_i32_0 = arith.constant 0 : i32
    %c0_i32_1 = arith.constant 0 : i32
    return %c0_i32, %c0_i32_0 : i32, i32
  }
  func.func @transform_8(%arg0: i32, %arg1: i32) -> (i32, i32) {
    %c0_i32 = arith.constant 0 : i32
    %c0_i32_0 = arith.constant 0 : i32
    %c0_i32_1 = arith.constant 0 : i32
    return %c0_i32, %c0_i32_0 : i32, i32
  }
  func.func @transform_9(%arg0: i32, %arg1: i32) -> (i32, i32) {
    %c0_i32 = arith.constant 0 : i32
    %c0_i32_0 = arith.constant 0 : i32
    %c0_i32_1 = arith.constant 0 : i32
    return %c0_i32, %c0_i32_0 : i32, i32
  }
  func.func @transform_10(%arg0: i32, %arg1: i32) -> (i32, i32) {
    %c0_i32 = arith.constant 0 : i32
    %c0_i32_0 = arith.constant 0 : i32
    %c0_i32_1 = arith.constant 0 : i32
    return %c0_i32, %c0_i32_0 : i32, i32
  }
  func.func @transform_11(%arg0: i32, %arg1: i32) -> (i32, i32) {
    %c0_i32 = arith.constant 0 : i32
    %c0_i32_0 = arith.constant 0 : i32
    %c0_i32_1 = arith.constant 0 : i32
    return %c0_i32, %c0_i32_0 : i32, i32
  }
  func.func @transform_12(%arg0: i32, %arg1: i32) -> (i32, i32) {
    %c0_i32 = arith.constant 0 : i32
    %c0_i32_0 = arith.constant 0 : i32
    %c0_i32_1 = arith.constant 0 : i32
    return %c0_i32, %c0_i32_0 : i32, i32
  }
  func.func @transform_13(%arg0: i32, %arg1: i32) -> (i32, i32) {
    %c0_i32 = arith.constant 0 : i32
    %c0_i32_0 = arith.constant 0 : i32
    %c0_i32_1 = arith.constant 0 : i32
    return %c0_i32, %c0_i32_0 : i32, i32
  }
  func.func @transform_14(%arg0: i32, %arg1: i32) -> (i32, i32) {
    %c0_i32 = arith.constant 0 : i32
    %c0_i32_0 = arith.constant 0 : i32
    %c0_i32_1 = arith.constant 0 : i32
    return %c0_i32, %c0_i32_0 : i32, i32
  }
  func.func @transform_15(%arg0: i32, %arg1: i32) -> (i32, i32, i32) {
    %c0_i32 = arith.constant 0 : i32
    %c0_i32_0 = arith.constant 0 : i32
    return %arg0, %arg1, %c0_i32 : i32, i32, i32
  }
}

</mosaic_0001>

<bundles_post_ra>
// kernel: tpu_custom_call.1
= control target key start
LH: loop header
LB: loop body
LE: loop exit
PB: predicated region body
PF: predicated region fallthrough
CT: control target
= control target key end

     0   :  { %s2072_s0 = inlined_call_operand.vmem [shape: f32[2,16,32], index: 0, kind: input, shape index: {}]   ;;  %s2073_s1 = inlined_call_operand.vmem [shape: bf16[32,32], index: 1, kind: input, shape index: {}]   ;;  %s2074_s2 = inlined_call_operand.vmem [shape: f32[1,32], index: 2, kind: input, shape index: {}]   ;;  %s2075_s3 = inlined_call_operand.hbm [shape: bf16[32,64], index: 3, kind: input, shape index: {}]   ;;  %s2076_s4 = inlined_call_operand.vmem [shape: f32[1,64], index: 4, kind: input, shape index: {}]   ;;  %s2077_s5 = inlined_call_operand.hbm [shape: bf16[32,32], index: 5, kind: input, shape index: {}]   ;;  %s2078_s6 = inlined_call_operand.vmem [shape: f32[1,32], index: 6, kind: input, shape index: {}]   ;;  %s2079_s7 = inlined_call_operand.vmem [shape: f32[1,32], index: 7, kind: input, shape index: {}]   ;;  %s2080_s8 = inlined_call_operand.vmem [shape: f32[1,32], index: 8, kind: input, shape index: {}]   ;;  %s2081_s9 = inlined_call_operand.hbm [shape: bf16[32,64], index: 9, kind: input, shape index: {}]   ;;  %s2082_s10 = inlined_call_operand.vmem [shape: f32[1,64], index: 10, kind: input, shape index: {}]   ;;  %s2083_s11 = inlined_call_operand.vmem [shape: bf16[64,32], index: 11, kind: input, shape index: {}]   ;;  %s2084_s12 = inlined_call_operand.vmem [shape: f32[1,32], index: 12, kind: input, shape index: {}]   ;;  %s2085_s13 = inlined_call_operand.vmem [shape: f32[1,32], index: 13, kind: input, shape index: {}]   ;;  %s2086_s14 = inlined_call_operand.vmem [shape: f32[1,32], index: 14, kind: input, shape index: {}]   ;;  %s2087_s15 = inlined_call_operand.hbm [shape: f32[2,16,32], index: 15, kind: output, shape index: {}]  }
   0x1   :  { %2100 = sst [smem:[#allocation24_spill]] %s2077_s5 }
   0x2   :  { %2101 = sst [smem:[#allocation25_spill]] %s2084_s12 }
   0x3   :  { %2102 = sst [smem:[#allocation26_spill]] %s2085_s13 }
   0x4   :  { %2103 = sst [smem:[#allocation27_spill]] %s2086_s14 }
   0x5   :  { %2104 = sst [smem:[#allocation28_spill]] %s2087_s15 }
   0x6   :  { %20 = vsyncpa [#allocation5], 0 }
   0x7   :  { %21 = vsyncpa [#allocation8], 0 }
   0x8   :  { %22 = vsyncpa [#allocation6], 0 }
   0x9   :  { %24 = vsyncpa [#allocation6 + $0x1], 0  ;;  %s1802_s18 = smov 0   ;;  %s1804_s19 = smov 0  }
   0xa   :  { %s1806_s20 = smov 0   ;;  %s1808_s21 = smov 0  }
   0xb   :  { %s1810_s22 = smov 0   ;;  %s1812_s23 = smov 0  }
   0xc   :  { %s1814_s24 = smov 0   ;;  %s1816_s25 = smov 0  }
   0xd LB: > { %2105 = sst [smem:[#allocation14_spill]] %s1676_s18  ;;  %s1260_s26 = sadd.s32 4294967295, %s1704_s25   ;;  %s1704_s25 = sphi %s1816_s25, %s30_s25   ;;  %s1700_s24 = sphi %s1814_s24, %s2134_s24   ;;  %s1696_s23 = sphi %s1812_s23, %s2133_s23   ;;  %s1692_s22 = sphi %s1810_s22, %s2132_s22   ;;  %s1688_s21 = sphi %s1808_s21, %s2131_s21   ;;  %s1684_s20 = sphi %s1806_s20, %s2130_s20   ;;  %s1680_s19 = sphi %s1804_s19, %s2136_s19   ;;  %s1676_s18 = sphi %s1802_s18, %s2135_s18  }
   0xe   : > { %2106 = sst [smem:[#allocation15_spill]] %s1684_s20  ;;  %s1261_s27 = sadd.s32 4294967294, %s1704_s25  }
   0xf   : > { %2107 = sst [smem:[#allocation16_spill]] %s1696_s23  ;;  %s39_s28 = sadd.s32 1, %s1696_s23 }
  0x10   : > { %2108 = sst [smem:[#allocation17_spill]] %s1700_s24  ;;  %s42_s29 = sadd.s32 1, %s1700_s24 }
  0x11   : > { %2109 = sst [smem:[#allocation18_spill]] %s1704_s25  ;;  %p40_p0 = scmp.ge.s32.totalorder %s39_s28, 2 }
  0x12   : > { %s371_s30 = sadd.s32 1, %s1684_s20  ;;  %p381_p1 = scmp.ne.s32.totalorder %s1684_s20, %s1680_s19 }
  0x13   : > { %p382_p2 = scmp.eq.s32.totalorder %s1260_s26, 3  ;;  %s2138_s28 = smov (%p40_p0, %s39_s28), 0 }
  0x14   : > { %2110 = sst [smem:[#allocation19_spill]] %s2138_s28  ;;  %s2140_s29 = smov (!%p40_p0, %s42_s29), %s1700_s24 }
  0x15   : > { %s367_s16 = ssub.s32 %s1696_s23, %s2138_s28  ;;  %p1854_p3 = por %p382_p2, %p381_p1 }
  0x16   : > { %p44_p4 = scmp.ge.s32.totalorder %s2140_s29, 2  ;;  %p387_p5 = scmp.ne.s32.totalorder %s1680_s19, %s1676_s18 }
  0x17   : > { %s2111_s17 = scalar_select %p1854_p3, 1, 0 }
  0x18   : > { %p388_p6 = scmp.eq.s32.totalorder %s1261_s27, 3  ;;  %p1262_p7 = scmp.ge.s32.totalorder %s1704_s25, 1 }
  0x19   : > { %2112 = sst [smem:[#allocation20_spill]] %s2111_s17  ;;  %s2142_s29 = smov (%p44_p4, %s2140_s29), 0 }
  0x1a   : > { %2113 = sst [smem:[#allocation21_spill]] %s2142_s29  ;;  %p1863_p8 = por %p388_p6, %p387_p5 }
  0x1b   : > { %p395_p9 = scmp.lt.s32.totalorder %s1704_s25, 5  ;;  %s366_s15 = ssub.s32 %s1700_s24, %s2142_s29 }
  0x1c   : > { %s2114_s14 = scalar_select %p1863_p8, 1, 0 }
  0x1d   : > { %s368_s13 = sor.u32 %s367_s16, %s366_s15  ;;  %p1870_p10 = pnand %p1262_p7, %p395_p9 }
  0x1e   : > { %2115 = sst [smem:[#allocation22_spill]] %s2114_s14  ;;  %p369_p11 = scmp.eq.s32.totalorder %s368_s13, 0 }
  0x1f   : > { %p1874_p12 = scmp.eq.s32.totalorder %s1260_s26, 0  ;;  %p1374_p13 = pneg %p1870_p10 }
  0x20   : > { %s1881_s27 = scalar_select %p369_p11, %s1684_s20, %s371_s30  }
  0x21   : > { %p1885_p0 = pnand %p1874_p12, %p1374_p13  ;;  %s2120_s5 = sld [smem:[#allocation24_spill]] }
  0x22   : > { %2118 = sst [smem:[#allocation23_spill]] %s1881_s27  ;;  %s1706_s26 = smov [#allocation7]  }
  0x23   : > { %s431_s29 = sshll.u32 %s1706_s26, 4  ;;  %s1707_s24 = smov 64   ;;  %s432_s29 = int_to_ptr.vmem [resolvable:$true] %s431_s29 }
  0x24   : > { %s1708_s18 = smov 4   ;;  %s412_s20 = sshll.u32 %s2075_s3, 4  ;;  %s413_s20 = int_to_ptr.hbm [resolvable:$true] %s412_s20 }
  0x25   : > { %s1709_s25 = smov [#allocation4]   ;;  %s1710_s26 = smov [#allocation9]  }
  0x26   : > { %s414_s17 = sshll.u32 %s1709_s25, 4  ;;  %s454_s12 = sshll.u32 %s1710_s26, 4  ;;  %s415_s17 = int_to_ptr.vmem [resolvable:$true] %s414_s17  ;;  %s455_s12 = int_to_ptr.vmem [resolvable:$true] %s454_s12 }
  0x27   : > { %s429_s13 = sshll.u32 %s2120_s5, 4  ;;  %s452_s5 = sshll.u32 %s2081_s9, 4  ;;  %s430_s13 = int_to_ptr.hbm [resolvable:$true] %s429_s13  ;;  %s453_s5 = int_to_ptr.hbm [resolvable:$true] %s452_s5 }
  0x28   : > { %1380 = dma.hbm_to_vmem [thread:$0]  (!%p1885_p0), %s430_s13, 256, %s432_s29, [#allocation8], %s1707_s24, %s1707_s24, %s1708_s18  }
  0x29   : > { %1377 = dma.hbm_to_vmem [thread:$0]  (!%p1885_p0), %s413_s20, 256, %s415_s17, [#allocation5], %s1707_s24, %s1707_s24, %s1708_s18  }
  0x2a   : > { %1383 = dma.hbm_to_vmem [thread:$0]  (!%p1885_p0), %s453_s5, 256, %s455_s12, [#allocation8], %s1707_s24, %s1707_s24, %s1708_s18  }
  0x2b   : > { %493 = sbr.rel (%p1870_p10) target bundleno = 2129 (0x851), region = 80 }
  0x30   : > { %1663 = dma.done.wait (%p1874_p12), [#allocation5], 256  }
  0x31   : > { %1665 = vsyncadd (%p1874_p12), [#allocation5], 4294967040 }
  0x32   : > { %1667 = dma.done.wait (%p1874_p12), [#allocation8], 512  }
  0x33   : > { %1669 = vsyncadd (%p1874_p12), [#allocation8], 4294966784  ;;  %s549_s5 = sand.u32 1, %s1680_s19   ;;  %p552_p1 = scmp.lt.s32.totalorder %s1692_s22, 1 }
  0x34   : > { %s1918_s12 = sshll.u32 %s549_s5, 3  ;;  %p1274_p2 = scmp.ne.s32.totalorder %s1688_s21, 0 }
  0x35   : > { %s553_s14 = scalar_select %p552_p1, %s1692_s22, 1 }
  0x36   : > { %s551_s28 = scalar_lea.vmem [#allocation10], %s1918_s12  ;;  %561 = sbr.rel (%p1274_p2) target bundleno = 206 (0xce), region = 96 }
  0x37   : > { %s1346_s18 = sshll.u32 %s553_s14, 4 }
  0x38   : > { %s556_s25 = scalar_lea.vmem %s2072_s0, %s1346_s18 }
  0x3b   : > { %v1348_v0 = vld [vmem:[#allocation4 + $0x8] sm:$0xff]  ;;  %v1347_v1 = vld [vmem:[#allocation4] sm:$0xff]  ;;  %v562_v2 = vld [vmem:[%s556_s25] sm:$0xff]  ;;  %vm585_vm0 = vcmask 261120   ;;  %vm605_vm1 = vcmask 519168  }
  0x3c   : > { %595 = vmatpush.bf16.msra.mxu0 %v1348_v0  ;;  %v563_v3 = vld [vmem:[%s556_s25 + $0x8] sm:$0xff]  ;;  %v1475_v5 = vld [vmem:[%s2076_s4] ss:$0 sm:$0xff] }
  0x3d   : > { %v564_v4 = vpack.c.bf16 %v563_v3, %v562_v2 }
  0x40   : > { %596 = vmatpush.bf16.msra.mxu0 %v1347_v1 }
  0x43   : > { %1283 = vmatmul.msk.bf16.vlgmr.msra.gmra.mxu0 %vm585_vm0, %v564_v4 }
  0xc0   : > { %v598_v6 = vpop.f32.mrf.mxu0 }
  0xc1   : > { %v599_v7 = vadd.f32 %v1475_v5, %v598_v6 }
  0xc3   : > { %v603_v8 = vpack.c.bf16 %v599_v7, %v599_v7 }
  0xc5   : > { %606 = vst.msk [vmem:[#allocation2] sm:$0xf] %vm605_vm1, %v603_v8 }
  0xc8   : > { %v600_v9 = vpop.f32.mrf.mxu0 }
  0xc9   : > { %v601_v10 = vadd.f32 %v1475_v5, %v600_v9 }
  0xcb   : > { %v604_v11 = vpack.c.bf16 %v601_v10, %v601_v10 }
  0xcd   : > { %607 = vst.msk [vmem:[#allocation2 + $0x4] sm:$0xf] %vm605_vm1, %v604_v11 }
  0xce PF: > { %v1350_v12 = vld [vmem:[%s2073_s1 + $0x8] sm:$0xff]  ;;  %s1284_s13 = sshll.u32 %s1688_s21, 3  ;;  %v1349_v13 = vld [vmem:[%s2073_s1] sm:$0xff]  ;;  %vm632_vm2 = vcmask 261120   ;;  %vm658_vm3 = vcmask 64512   ;;  %s1711_s26 = smov 112  }
  0xcf   : > { %s609_s16 = scalar_lea.vmem %s556_s25, %s1284_s13  ;;  %642 = vmatpush.bf16.msra.mxu0 %v1350_v12  ;;  %s1712_s14 = smov 104   ;;  %v1476_v18 = vld [vmem:[%s2074_s2] ss:$0 sm:$0xff]  ;;  %vm678_vm4 = vcmask 130048   ;;  %vm889_vm5 = vcmask 195584   ;;  %vm892_vm6 = vcmask 257024  }
  0xd0   : > { %v1936_v14 = vld [vmem:[%s609_s16] sm:$0xff]  ;;  %s1713_s18 = smov 120   ;;  %s1714_s25 = smov 88   ;;  %vm1070_vm14 = vcmask 523264  }
  0xd1   : > { %v611_v15 = vpack.c.bf16 %v1936_v14, %v1936_v14  ;;  %s1715_s23 = smov 96   ;;  %s1716_s29 = smov 80  }
  0xd2   : > { %s1717_s17 = smov 72   ;;  %s1718_s27 = smov 8  }
  0xd3   : > { %643 = vmatpush.bf16.msra.mxu0 %v1349_v13  ;;  %s1719_s13 = smov 24   ;;  %s1720_s30 = smov 16  }
  0xd4   : > { %v1941_v16 = vld [vmem:[#allocation2] sm:$0xff]  ;;  %s1342_s20 = sshll.u32 %s1692_s22, 1  ;;  %s2122_s22 = sld [smem:[#allocation26_spill]] }
  0xd5   : > { %v663_v17 = vsel %vm658_vm3, %v1941_v16, 0  ;;  %769 = vrot.lane.b32.xlu2 %v1941_v16, %s1711_s26  ;;  %823 = vrot.lane.b32.xlu1 %v1941_v16, %s1712_s14  ;;  %s1148_s24 = sadd.s32 %s1688_s21, %s1342_s20  ;;  %s1138_s20 = scalar_lea.sflag [#allocation6], %s549_s5 }
  0xd6   : > { %1293 = vmatmul.msk.bf16.vlgmr.msra.gmra.mxu0 %vm632_vm2, %v611_v15  ;;  %672 = vmatpush.bf16.xpose.msra.mxu1 %v663_v17 }
  0xd7   : > { %715 = vrot.lane.b32.xlu0 %v1941_v16, %s1713_s18 }
 0x12f   : > { %v770_v26 = vpop.permute.xlu2 %769 }
 0x130   : > { %v775_v27 = vsel %vm658_vm3, %v770_v26, 0 }
 0x131   : > { %784 = vmatpush.bf16.xpose.msrb.mxu0 %v775_v27 }
 0x147   : > { %v824_v30 = vpop.permute.xlu1 %823 }
 0x148   : > { %v829_v31 = vsel %vm658_vm3, %v824_v30, 0 }
 0x149   : > { %v716_v28 = vpop.permute.xlu0 %715 }
 0x14a   : > { %v721_v29 = vsel %vm658_vm3, %v716_v28, 0 }
 0x14b   : > { %730 = vmatpush.bf16.xpose.msra.mxu3 %v721_v29 }
 0x153   : > { %v645_v19 = vpop.f32.mrf.mxu0  ;;  %838 = vmatpush.bf16.xpose.msrb.mxu3 %v829_v31 }
 0x154   : > { %v646_v20 = vadd.f32 %v1476_v18, %v645_v19 }
 0x156   : > { %v649_v21 = vmul.f32 0.35355338, %v646_v20 }
 0x158   : > { %v650_v22 = vpack.c.bf16 %v649_v21, %v649_v21 }
 0x15a   : > { %v711_v23 = vunpack.c.l.b16 %v650_v22  ;;  %1298 = vmatmul.msk.bf16.vlgmr.msra.gmra.mxu1 %vm658_vm3, %v650_v22 }
 0x15b   : > { %v647_v24 = vpop.f32.mrf.mxu0 }
 0x15c   : > { %v712_v25 = vpack.c.b16 %v711_v23, %v711_v23 }
 0x15e   : > { %767 = vrot.lane.b32.xlu2 %v712_v25, %s1711_s26  ;;  %821 = vrot.lane.b32.xlu1 %v712_v25, %s1712_s14  ;;  %s2125_s26 = sld [smem:[#allocation27_spill]]  ;;  %s1152_s14 = sshll.u32 %s551_s28, 4  ;;  %s1153_s14 = int_to_ptr.vmem [resolvable:$true] %s1152_s14 }
 0x15f   : > { %713 = vrot.lane.b32.xlu0 %v712_v25, %s1713_s18  ;;  %s2121_s18 = sld [smem:[#allocation25_spill]] }
 0x1b8   : > { %v768_v32 = vpop.permute.xlu2 %767 }
 0x1b9   : > { %1302 = vmatmul.msk.bf16.vlgmr.msrb.gmra.mxu0 %vm658_vm3, %v768_v32  ;;  %v1353_v32 = vld [vmem:[#allocation7 + $0x8] sm:$0xff] }
 0x1ba   : > { %924 = vmatpush.bf16.msra.mxu0 %v1353_v32 }
 0x1d0   : > { %v822_v37 = vpop.permute.xlu1 %821 }
 0x1d1   : > { %v714_v33 = vpop.permute.xlu0 %713 }
 0x1d2   : > { %1300 = vmatmul.msk.bf16.vlgmr.msra.gmra.mxu3 %vm658_vm3, %v714_v33  ;;  %v1352_v33 = vld [vmem:[#allocation7] sm:$0xff] }
 0x1d3   : > { %925 = vmatpush.bf16.msra.mxu0 %v1352_v33 }
 0x1d7   : > { %v674_v34 = vpop.f32.mrf.mxu1 }
 0x1d8   : > { %v679_v35 = vsel %vm678_vm4, %v674_v34, -inf }
 0x1d9   : > { %680 = vmax.xlane.f32.xlu0 %v679_v35 }
 0x1df   : > { %v676_v36 = vpop.f32.mrf.mxu1 }
 0x1e2   : > { %1304 = vmatmul.msk.bf16.vlgmr.msrb.gmra.mxu3 %vm658_vm3, %v822_v37 }
 0x236   : > { %v786_v38 = vpop.f32.mrf.mxu0 }
 0x237   : > { %v790_v51 = vsel %vm678_vm4, %v786_v38, -inf }
 0x23e   : > { %v788_v39 = vpop.f32.mrf.mxu0 }
 0x24c   : > { %v681_v40 = vpop.xlane.xlu0 %680 }
 0x24d   : > { %v682_v41 = vsub.f32 %v674_v34, %v681_v40 }
 0x24f   : > { %v683_v42 = vmul.f32 1.442695, %v682_v41 }
 0x251   : > { %1484 = vpow2.f32 %v683_v42  ;;  %v1477_v42 = vld [vmem:[%s2078_s6] ss:$0 sm:$0xff] }
 0x255   : > { %v732_v43 = vpop.f32.mrf.mxu3 }
 0x256   : > { %v736_v44 = vsel %vm678_vm4, %v732_v43, -inf }
 0x257   : > { %v1485_v45 = vpop.eup %1484  ;;  %737 = vmax.xlane.f32.xlu1 %v736_v44 }
 0x258   : > { %v685_v46 = vsel %vm678_vm4, %v1485_v45, 0.0 }
 0x259   : > { %686 = vadd.xlane.f32.xlu0 %v685_v46 }
 0x25d   : > { %v734_v47 = vpop.f32.mrf.mxu3 }
 0x265   : > { %v840_v48 = vpop.f32.mrf.mxu3 }
 0x266   : > { %v844_v49 = vsel %vm678_vm4, %v840_v48, -inf }
 0x267   : > { %845 = vmax.xlane.f32.xlu2 %v844_v49 }
 0x26d   : > { %v842_v50 = vpop.f32.mrf.mxu3  ;;  %748 = vrot.lane.b32.xlu0 %v1941_v16, %s1714_s25  ;;  %s1343_s25 = sshll.u32 %s1148_s24, 3 }
 0x26f   : > { %791 = vmax.xlane.f32.xlu2 %v790_v51 }
 0x270   : > { %691 = vrot.lane.b32.xlu1 %v1941_v16, %s1715_s23 }
 0x275   : > { %802 = vrot.lane.b32.xlu0 %v1941_v16, %s1716_s29 }
 0x278   : > { %856 = vrot.lane.b32.xlu1 %v1941_v16, %s1717_s17 }
 0x2ca   : > { %v738_v52 = vpop.xlane.xlu1 %737 }
 0x2cb   : > { %v739_v53 = vsub.f32 %v732_v43, %v738_v52 }
 0x2cc   : > { %v687_v55 = vpop.xlane.xlu0 %686 }
 0x2cd   : > { %v740_v54 = vmul.f32 1.442695, %v739_v53 }
 0x2cf   : > { %1486 = vpow2.f32 %v740_v54 }
 0x2d0   : > { %1488 = vrcp.f32 %v687_v55 }
 0x2d5   : > { %v1487_v56 = vpop.eup %1486 }
 0x2d6   : > { %v742_v57 = vsel %vm678_vm4, %v1487_v56, 0.0  ;;  %v1489_v60 = vpop.eup %1488 }
 0x2d7   : > { %743 = vadd.xlane.f32.xlu2 %v742_v57  ;;  %v689_v62 = vmul.f32 %v1489_v60, %v1485_v45  ;;  %v1354_v60 = vld [vmem:[#allocation9] sm:$0xff] }
 0x2d9   : > { %v690_v3 = vpack.c.bf16 %v689_v62, %v689_v62 }
 0x2da   : > { %v846_v58 = vpop.xlane.xlu2 %845 }
 0x2db   : > { %v847_v59 = vsub.f32 %v840_v48, %v846_v58  ;;  %v1721_v48 = vmov 32.0  }
 0x2dd   : > { %v848_v61 = vmul.f32 1.442695, %v847_v59  ;;  %v1355_v59 = vld [vmem:[#allocation9 + $0x8] sm:$0xff] }
 0x2df   : > { %1490 = vpow2.f32 %v848_v61  ;;  %v749_v63 = vpop.permute.xlu0 %748 }
 0x2e2   : > { %v692_v0 = vpop.permute.xlu1 %691  ;;  %v792_v1 = vpop.xlane.xlu2 %791 }
 0x2e3   : > { %v793_v2 = vsub.f32 %v786_v38, %v792_v1  ;;  %704 = vmatpush.bf16.msra.mxu2 %v692_v0 }
 0x2e5   : > { %v1491_v4 = vpop.eup %1490  ;;  %v794_v5 = vmul.f32 1.442695, %v793_v2 }
 0x2e6   : > { %1299 = vmatmul.msk.bf16.vlgmr.msra.gmra.mxu2 %vm678_vm4, %v690_v3  ;;  %v850_v6 = vsel %vm678_vm4, %v1491_v4, 0.0 }
 0x2e7   : > { %761 = vmatpush.bf16.msrb.mxu2 %v749_v63  ;;  %1492 = vpow2.f32 %v794_v5  ;;  %851 = vadd.xlane.f32.xlu2 %v850_v6  ;;  %v803_v10 = vpop.permute.xlu0 %802 }
 0x2e8   : > { %815 = vmatpush.bf16.msrb.mxu1 %v803_v10 }
 0x2ea   : > { %v857_v9 = vpop.permute.xlu1 %856 }
 0x2eb   : > { %869 = vmatpush.bf16.msra.mxu2 %v857_v9 }
 0x2ec   : > { %1017 = vmatpush.bf16.msra.mxu1 %v1355_v59 }
 0x2ed   : > { %v1493_v7 = vpop.eup %1492 }
 0x2ee   : > { %v796_v8 = vsel %vm678_vm4, %v1493_v7, 0.0 }
 0x2ef   : > { %797 = vadd.xlane.f32.xlu2 %v796_v8 }
 0x2f0   : > { %1018 = vmatpush.bf16.msra.mxu1 %v1354_v60 }
 0x34a   : > { %v744_v11 = vpop.xlane.xlu2 %743 }
 0x34b   : > { %1494 = vrcp.f32 %v744_v11 }
 0x351   : > { %v1495_v12 = vpop.eup %1494 }
 0x352   : > { %v746_v13 = vmul.f32 %v1495_v12, %v1487_v56 }
 0x354   : > { %v747_v15 = vpack.c.bf16 %v746_v13, %v746_v13 }
 0x356   : > { %1301 = vmatmul.msk.bf16.vlgmr.msrb.gmra.mxu2 %vm678_vm4, %v747_v15 }
 0x35a   : > { %v852_v16 = vpop.xlane.xlu2 %851 }
 0x35b   : > { %1496 = vrcp.f32 %v852_v16 }
 0x361   : > { %v1497_v17 = vpop.eup %1496 }
 0x362   : > { %v854_v18 = vmul.f32 %v1497_v17, %v1491_v4  ;;  %v798_v19 = vpop.xlane.xlu2 %797 }
 0x363   : > { %1498 = vrcp.f32 %v798_v19 }
 0x364   : > { %v855_v20 = vpack.c.bf16 %v854_v18, %v854_v18  ;;  %1500 = vrcp.f32 %v1721_v48 }
 0x366   : > { %1305 = vmatmul.msk.bf16.vlgmr.msra.gmra.mxu2 %vm678_vm4, %v855_v20  ;;  %v1478_v20 = vld [vmem:[%s2079_s7] ss:$0 sm:$0xff] }
 0x369   : > { %v1499_v21 = vpop.eup %1498  ;;  %v706_v22 = vpop.f32.mrf.mxu2 }
 0x36a   : > { %v800_v23 = vmul.f32 %v1499_v21, %v1493_v7  ;;  %v1501_v49 = vpop.eup %1500 }
 0x36b   : > { %v938_v50 = vmul.f32 32.0, %v1501_v49  ;;  %vm942_vm7 = vweird.f32 %v1501_v49 }
 0x36c   : > { %v801_v24 = vpack.c.bf16 %v800_v23, %v800_v23  ;;  %v1479_v23 = vld [vmem:[%s2080_s8] ss:$0 sm:$0xff] }
 0x36d   : > { %v939_v51 = vsub.f32 1.0, %v938_v50 }
 0x36e   : > { %1303 = vmatmul.msk.bf16.vlgmr.msrb.gmra.mxu1 %vm678_vm4, %v801_v24 }
 0x36f   : > { %v940_v52 = vmul.f32 %v1501_v49, %v939_v51 }
 0x371   : > { %v708_v25 = vpop.f32.mrf.mxu2  ;;  %v941_v53 = vadd.f32 %v1501_v49, %v940_v52 }
 0x373   : > { %v1982_v54 = vsel %vm942_vm7, %v1501_v49, %v941_v53 }
 0x3d9   : > { %v763_v26 = vpop.f32.mrf.mxu2 }
 0x3da   : > { %876 = vrot.lane.b32.xlu2 %v763_v26, %s1718_s27  ;;  %s2123_s27 = sld [smem:[#allocation28_spill]] }
 0x3e1   : > { %v765_v27 = vpop.f32.mrf.mxu2 }
 0x3e2   : > { %v1359_v27 = vld [vmem:[%s2083_s11 + $0x18] sm:$0xff] }
 0x3e3   : > { %1078 = vmatpush.bf16.msra.mxu3 %v1359_v27 }
 0x3e9   : > { %v871_v28 = vpop.f32.mrf.mxu2 }
 0x3ea   : > { %884 = vrot.lane.b32.xlu0 %v871_v28, %s1719_s13  ;;  %v1358_v28 = vld [vmem:[%s2083_s11 + $0x10] sm:$0xff]  ;;  %s1150_s13 = scalar_lea.hbm %s2123_s27, %s1343_s25 }
 0x3eb   : > { %v817_v29 = vpop.f32.mrf.mxu1  ;;  %1079 = vmatpush.bf16.msra.mxu3 %v1358_v28 }
 0x3ec   : > { %880 = vrot.lane.b32.xlu1 %v817_v29, %s1720_s30  ;;  %v1357_v29 = vld [vmem:[%s2083_s11 + $0x8] sm:$0xff] }
 0x3ef   : > { %1080 = vmatpush.bf16.msra.mxu3 %v1357_v29 }
 0x3f1   : > { %v873_v30 = vpop.f32.mrf.mxu2 }
 0x3f2   : > { %v1356_v30 = vld [vmem:[%s2083_s11] sm:$0xff] }
 0x3f3   : > { %v819_v31 = vpop.f32.mrf.mxu1  ;;  %1081 = vmatpush.bf16.msra.mxu3 %v1356_v30 }
 0x3f4   : > { %v1480_v31 = vld [vmem:[%s2082_s10] ss:$0 sm:$0xff] }
 0x434   : > { %v877_v34 = vpop.permute.xlu2 %876 }
 0x435   : > { %v887_v35 = vsel %vm658_vm3, %v706_v22, %v877_v34 }
 0x45c   : > { %v885_v37 = vpop.permute.xlu0 %884 }
 0x45e   : > { %v881_v36 = vpop.permute.xlu1 %880 }
 0x45f   : > { %v888_v38 = vsel %vm678_vm4, %v887_v35, %v881_v36 }
 0x460   : > { %v890_v39 = vsel %vm889_vm5, %v888_v38, %v885_v37 }
 0x461   : > { %v891_v40 = vpack.c.bf16 %v890_v39, %v890_v39 }
 0x463   : > { %893 = vst.msk [vmem:[#allocation3] sm:$0xf] %vm892_vm6, %v891_v40 }
 0x46a   : > { %v894_v41 = vld [vmem:[#allocation3] sm:$0xf] }
 0x46b   : > { %1314 = vmatmul.msk.bf16.vlgmr.msra.gmra.mxu0 %vm632_vm2, %v894_v41 }
 0x4e8   : > { %v927_v43 = vpop.f32.mrf.mxu0 }
 0x4e9   : > { %v928_v44 = vadd.f32 %v1477_v42, %v927_v43 }
 0x4eb   : > { %v931_v45 = vadd.f32 %v928_v44, %v1936_v14 }
 0x4ed   : > { %v934_v46 = vsel %vm632_vm2, %v931_v45, 0.0 }
 0x4ee   : > { %935 = vadd.xlane.f32.xlu1 %v934_v46 }
 0x4f0   : > { %v929_v47 = vpop.f32.mrf.mxu0 }
 0x561   : > { %v936_v55 = vpop.xlane.xlu1 %935 }
 0x562   : > { %v944_v56 = vmul.f32 %v1982_v54, %v936_v55 }
 0x564   : > { %v945_v57 = vsub.f32 %v931_v45, %v944_v56  ;;  %v1481_v45 = vld [vmem:[%s2121_s18] ss:$0 sm:$0xff]  ;;  %s1154_s18 = sshll.u32 %s1150_s13, 4  ;;  %s1155_s18 = int_to_ptr.hbm [resolvable:$true] %s1154_s18 }
 0x565   : > { %s1616_s24 = sshra.s32 %s1155_s18, 4  ;;  %s1617_s24 = int_to_ptr.hbm [resolvable:$true] %s1616_s24 }
 0x566   : > { %v946_v58 = vmul.f32 %v945_v57, %v945_v57  ;;  %s1618_s25 = scalar_lea.hbm %s1617_s24, 8  ;;  %p1623_p7 = scmp.lt.s32.totalorder %s1617_s24, %s2123_s27 }
 0x567   : > { %p1619_p4 = scmp.ne.s32.totalorder %s1617_s24, %s1618_s25 }
 0x568   : > { %v947_v14 = vsel %vm632_vm2, %v946_v58, 0.0 }
 0x569   : > { %948 = vadd.xlane.f32.xlu0 %v947_v14  ;;  %p1620_p5 = pnand %p1619_p4, %p1854_p3 }
 0x56b   : > { %p1621_p6 = pneg %p1620_p5 }
 0x5dc   : > { %v949_v61 = vpop.xlane.xlu0 %948 }
 0x5dd   : > { %v950_v62 = vmul.f32 %v949_v61, %v1982_v54 }
 0x5df   : > { %v951_v63 = vadd.f32 1e-05, %v950_v62 }
 0x5e1   : > { %1502 = vrsqrt.f32 %v951_v63  ;;  %vm959_vm8 = vcmp.eq.f32.partialorder %v951_v63, inf  ;;  %v962_v7 = vand.u32 2147483648, %v951_v63  ;;  %vm961_vm9 = vcmp.eq.f32.partialorder %v951_v63, 0.0 }
 0x5e7   : > { %v1503_v0 = vpop.eup %1502 }
 0x5e8   : > { %v953_v1 = vmul.f32 %v1503_v0, %v951_v63 }
 0x5ea   : > { %v954_v2 = vmul.f32 %v1503_v0, %v953_v1 }
 0x5ec   : > { %v955_v3 = vmul.f32 0.5, %v954_v2 }
 0x5ee   : > { %v956_v4 = vsub.f32 1.5, %v955_v3 }
 0x5f0   : > { %v957_v5 = vmul.f32 %v1503_v0, %v956_v4 }
 0x5f2   : > { %v958_v6 = vmul.f32 %v957_v5, %v951_v63 }
 0x5f4   : > { %v960_v8 = vsel %vm959_vm8, %v951_v63, %v958_v6 }
 0x5f5   : > { %v963_v9 = vsel %vm961_vm9, %v962_v7, %v960_v8 }
 0x5f6   : > { %1504 = vrcp.f32 %v963_v9  ;;  %v975_v13 = vand.u32 2147483648, %v963_v9  ;;  %v973_v16 = vand.u32 2147483647, %v963_v9  ;;  %vm969_vm11 = vweird.f32 %v963_v9 }
 0x5f8   : > { %v976_v18 = vor.u32 1.1754944e-38, %v975_v13  ;;  %vm974_vm13 = vcmp.eq.f32.partialorder %v973_v16, 8.507059e+37  ;;  %v1482_v13 = vld [vmem:[%s2122_s22] ss:$0 sm:$0xff]  ;;  %s1622_s22 = scalar_lea.hbm %s2123_s27, 32 }
 0x5f9   : > { %p1624_p9 = scmp.lt.s32.totalorder %s1622_s22, %s1618_s25 }
 0x5fb   : > { %p1625_p10 = por %p1624_p9, %p1623_p7 }
 0x5fc   : > { %v1505_v10 = vpop.eup %1504 }
 0x5fd   : > { %v965_v11 = vmul.f32 %v1505_v10, %v963_v9  ;;  %vm970_vm10 = vweird.f32 %v1505_v10  ;;  %p1626_p11 = pnand %p1625_p10, %p1621_p6 }
 0x5fe   : > { %vm971_vm12 = vmor %vm969_vm11, %vm970_vm10 }
 0x5ff   : > { %v966_v12 = vsub.f32 1.0, %v965_v11 }
 0x601   : > { %v967_v15 = vmul.f32 %v1505_v10, %v966_v12 }
 0x603   : > { %v968_v17 = vadd.f32 %v1505_v10, %v967_v15 }
 0x605   : > { %v972_v19 = vsel %vm971_vm12, %v1505_v10, %v968_v17  ;;  %v1483_v17 = vld [vmem:[%s2125_s26] ss:$0 sm:$0xff] }
 0x606   : > { %v977_v21 = vsel %vm974_vm13, %v976_v18, %v972_v19 }
 0x607   : > { %v978_v22 = vmul.f32 %v977_v21, %v945_v57 }
 0x609   : > { %v982_v24 = vmul.f32 %v1478_v20, %v978_v22 }
 0x60b   : > { %v986_v25 = vadd.f32 %v1479_v23, %v982_v24 }
 0x60d   : > { %v987_v26 = vpack.c.bf16 %v986_v25, %v986_v25 }
 0x60f   : > { %1323 = vmatmul.msk.bf16.vlgmr.msra.gmra.mxu1 %vm632_vm2, %v987_v26 }
 0x68c   : > { %v1020_v32 = vpop.f32.mrf.mxu1 }
 0x68d   : > { %v1021_v33 = vadd.f32 %v1480_v31, %v1020_v32 }
 0x68f   : > { %v1025_v34 = vmul.f32 0.044715, %v1021_v33  ;;  %v1024_v41 = vmul.f32 0.5, %v1021_v33 }
 0x691   : > { %v1026_v35 = vmul.f32 %v1025_v34, %v1021_v33 }
 0x693   : > { %v1027_v36 = vmul.f32 %v1026_v35, %v1021_v33 }
 0x694   : > { %v1022_v37 = vpop.f32.mrf.mxu1 }
 0x695   : > { %v1028_v38 = vadd.f32 %v1027_v36, %v1021_v33 }
 0x697   : > { %v1029_v39 = vmul.f32 0.7978846, %v1028_v38 }
 0x699   : > { %1506 = vtanh.f32 %v1029_v39 }
 0x69f   : > { %v1507_v40 = vpop.eup %1506 }
 0x6a0   : > { %v1031_v42 = vadd.f32 1.0, %v1507_v40 }
 0x6a2   : > { %v1032_v43 = vmul.f32 %v1031_v42, %v1024_v41 }
 0x6a4   : > { %v1033_v44 = vpack.c.bf16 %v1032_v43, %v1032_v43 }
 0x6a6   : > { %1340 = vmatmul.msk.bf16.vlgmr.msra.gmra.mxu3 %vm1070_vm14, %v1033_v44 }
 0x729   : > { %v1083_v46 = vpop.f32.mrf.mxu3 }
 0x72a   : > { %v1084_v47 = vadd.f32 %v1481_v45, %v1083_v46 }
 0x72c   : > { %v1087_v48 = vadd.f32 %v1084_v47, %v986_v25 }
 0x72e   : > { %v1090_v49 = vsel %vm632_vm2, %v1087_v48, 0.0 }
 0x72f   : > { %1091 = vadd.xlane.f32.xlu2 %v1090_v49 }
 0x731   : > { %v1085_v50 = vpop.f32.mrf.mxu3 }
 0x7a2   : > { %v1092_v51 = vpop.xlane.xlu2 %1091 }
 0x7a3   : > { %v1093_v52 = vmul.f32 %v1092_v51, %v1982_v54 }
 0x7a5   : > { %v1094_v53 = vsub.f32 %v1087_v48, %v1093_v52 }
 0x7a7   : > { %v1095_v55 = vmul.f32 %v1094_v53, %v1094_v53 }
 0x7a9   : > { %v1096_v56 = vsel %vm632_vm2, %v1095_v55, 0.0 }
 0x7aa   : > { %1097 = vadd.xlane.f32.xlu1 %v1096_v56 }
 0x81d   : > { %v1098_v57 = vpop.xlane.xlu1 %1097 }
 0x81e   : > { %v1099_v58 = vmul.f32 %v1098_v57, %v1982_v54 }
 0x820   : > { %v1100_v14 = vadd.f32 1e-05, %v1099_v58 }
 0x822   : > { %1508 = vrsqrt.f32 %v1100_v14  ;;  %vm1108_vm15 = vcmp.eq.f32.partialorder %v1100_v14, inf  ;;  %v1111_v2 = vand.u32 2147483648, %v1100_v14  ;;  %vm1110_vm0 = vcmp.eq.f32.partialorder %v1100_v14, 0.0 }
 0x828   : > { %v1509_v59 = vpop.eup %1508 }
 0x829   : > { %v1102_v60 = vmul.f32 %v1509_v59, %v1100_v14 }
 0x82b   : > { %v1103_v61 = vmul.f32 %v1509_v59, %v1102_v60 }
 0x82d   : > { %v1104_v62 = vmul.f32 0.5, %v1103_v61 }
 0x82f   : > { %v1105_v63 = vsub.f32 1.5, %v1104_v62 }
 0x831   : > { %v1106_v0 = vmul.f32 %v1509_v59, %v1105_v63 }
 0x833   : > { %v1107_v1 = vmul.f32 %v1106_v0, %v1100_v14 }
 0x835   : > { %v1109_v3 = vsel %vm1108_vm15, %v1100_v14, %v1107_v1 }
 0x836   : > { %v1112_v4 = vsel %vm1110_vm0, %v1111_v2, %v1109_v3 }
 0x837   : > { %1510 = vrcp.f32 %v1112_v4  ;;  %v1124_v7 = vand.u32 2147483648, %v1112_v4  ;;  %v1122_v9 = vand.u32 2147483647, %v1112_v4  ;;  %vm1118_vm3 = vweird.f32 %v1112_v4 }
 0x839   : > { %v1125_v11 = vor.u32 1.1754944e-38, %v1124_v7  ;;  %vm1123_vm5 = vcmp.eq.f32.partialorder %v1122_v9, 8.507059e+37 }
 0x83d   : > { %v1511_v5 = vpop.eup %1510 }
 0x83e   : > { %v1114_v54 = vmul.f32 %v1511_v5, %v1112_v4  ;;  %vm1119_vm1 = vweird.f32 %v1511_v5 }
 0x83f   : > { %vm1120_vm4 = vmor %vm1118_vm3, %vm1119_vm1 }
 0x840   : > { %v1115_v6 = vsub.f32 1.0, %v1114_v54 }
 0x842   : > { %v1116_v8 = vmul.f32 %v1511_v5, %v1115_v6 }
 0x844   : > { %v1117_v10 = vadd.f32 %v1511_v5, %v1116_v8 }
 0x846   : > { %v1121_v12 = vsel %vm1120_vm4, %v1511_v5, %v1117_v10 }
 0x847   : > { %v1126_v15 = vsel %vm1123_vm5, %v1125_v11, %v1121_v12 }
 0x848   : > { %v1127_v16 = vmul.f32 %v1126_v15, %v1094_v53 }
 0x84a   : > { %v1131_v18 = vmul.f32 %v1482_v13, %v1127_v16 }
 0x84c   : > { %v1135_v19 = vadd.f32 %v1483_v17, %v1131_v18 }
 0x84e   : > { %1136 = vst.msk [vmem:[%s551_s28] sm:$0xff] %vm632_vm2, %v1135_v19 }
 0x84f   : > { %1629 = shalt.err (!%p1626_p11)
}
 0x850   : > { %1372 = dma.vmem_to_hbm [thread:$0]  (%p1854_p3), %s1153_s14, 128, %s1155_s18, %s1138_s20  }
 0x851 PF: > { %s2126_s5 = sld [smem:[#allocation18_spill]] }
 0x852   : > { %s2127_s12 = sld [smem:[#allocation14_spill]] }
 0x857   : > { %p1394_p12 = scmp.ge.s32.totalorder %s2126_s5, 2 }
 0x858   : > { %s1166_s13 = sand.u32 1, %s2127_s12  }
 0x859   : > { %p1385_p13 = pnand %p1394_p12, %p1863_p8  ;;  %s1167_s15 = scalar_lea.sflag [#allocation6], %s1166_s13 }
 0x85b   : > { %p1386_p0 = pneg %p1385_p13 }
 0x85d   : > { %1671 = dma.done.wait (%p1386_p0), %s1167_s15, 128  }
 0x85e   : > { %1673 = vsyncadd (%p1386_p0), %s1167_s15, 4294967168  ;;  %s30_s25 = sadd.s32 1, %s2126_s5   ;;  %s2129_s16 = sld [smem:[#allocation15_spill]] }
 0x85f   : > { %p27_p1 = scmp.ge.s32.totalorder %s30_s25, 6   ;;  %s2130_s20 = sld [smem:[#allocation23_spill]] }
 0x860   : > { %s2131_s21 = sld [smem:[#allocation16_spill]]  ;;  %s2135_s18 = smov %s1680_s19 }
 0x861   : > { %s2132_s22 = sld [smem:[#allocation17_spill]]  ;;  %29 = sbr.rel (!%p27_p1) target bundleno = 13 (0xd), region = 133 }
 0x862   : > { %s2133_s23 = sld [smem:[#allocation19_spill]] }
 0x863   : > { %s2134_s24 = sld [smem:[#allocation21_spill]] }
 0x864   : > { %s2136_s19 = smov %s2129_s16 }
 0x866   :  { %1173 = vsyncpa [#allocation5], 1 }
 0x867   :  { %1175 = vsyncpa [#allocation5 + $0x1], 1 }
 0x868   :  { %1176 = vsyncpa [#allocation8], 1 }
 0x869   :  { %1177 = vsyncpa [#allocation6], 1 }
 0x86a   :  { %1179 = vsyncpa [#allocation6 + $0x1], 1 }

</bundles_post_ra>
